<compile_context>
chip_gen: v7x
topology: tpu7x:2x2x1
jax: 0.10.0
libtpu: 0.0.40
codegen_flags: <defaults>
</compile_context>

<pallas_src>
import math

import jax
import jax.numpy as jnp
from jax.experimental import pallas as pl
from jax.experimental.pallas import tpu as pltpu


_TARGET_TILE_BYTES = 4 * 1024 * 1024     # ~4 MiB of x per tile
_MAX_FULLWIDTH_COLS = 8192               # split columns only beyond this width
_SPLIT_COL_BLOCK = 4096                  # column tile when splitting (mult of 128)
_VMEM_LIMIT_BYTES = 32 * 1024 * 1024     # within every generation's physical VMEM


def _mask_kernel(x_ref, keep_ref, o_ref):
    # x_ref:    (block_r, block_c) tile of (reshaped) node features
    # keep_ref: (1, block_c) float32 row; 1.0 = keep column, 0.0 = zero it
    # o_ref:    (block_r, block_c) output tile
    x = x_ref[...]
    keep = keep_ref[...] != jnp.float32(0.0)
    # select (not multiply): masked columns become exactly 0 even if x holds
    # NaN/Inf, matching the reference `x[:, idx] = 0`.
    o_ref[...] = jnp.where(keep, x, jnp.zeros_like(x))


def _pick_tiles(rows, cols, dtype):
    """Choose (block_r, block_c) obeying the (8, 128) rules and VMEM budget."""
    itemsize = jnp.dtype(dtype).itemsize
    # Full vreg packing along sublanes: 8 rows for 4-byte, 16 for 2-byte,
    # 32 for 1-byte dtypes.
    sublane_pack = 8 * max(1, 4 // itemsize)

    if cols % 128 == 0 and cols > _MAX_FULLWIDTH_COLS:
        block_c = _SPLIT_COL_BLOCK       # very wide & lane-aligned: split on 128-aligned tiles
    else:
        # Full width: contiguous HBM streams, 1-D grid, resident keep row.
        # (When cols % 128 != 0 this is also the only legal choice.)
        block_c = cols

    block_r = _TARGET_TILE_BYTES // max(1, block_c * itemsize)
    block_r = max(sublane_pack, (block_r // sublane_pack) * sublane_pack)

    if block_r >= rows:
        if rows > sublane_pack:
            # Shrink so there are >= 2 row tiles: lets the 'parallel' row axis
            # shard across both v7x TensorCores instead of idling one.
            half = -(-rows // 2)
            block_r = -(-half // sublane_pack) * sublane_pack
            block_r = min(block_r, rows)
        else:
            block_r = rows               # full-height block is always legal
    return block_r, block_c


def node_feature_masking_kernel(x2d, keep_row2d, *, donate_x=False):
    """Column-mask a 2-D slab: out[r, c] = x2d[r, c] if keep_row2d[0, c] else 0."""
    rows, cols = x2d.shape
    block_r, block_c = _pick_tiles(rows, cols, x2d.dtype)
    n_row_blocks = pl.cdiv(rows, block_r)
    n_col_blocks = pl.cdiv(cols, block_c)

    itemsize = jnp.dtype(x2d.dtype).itemsize
    cost = pl.CostEstimate(flops=0, transcendentals=0,
                           bytes_accessed=2 * rows * cols * itemsize)

    extra = {}
    if donate_x:
        # In-place update when the caller actually donates x (e.g. via
        # jit donate_argnums); otherwise the caller's copy of x would be
        # clobbered, so this stays opt-in.
        extra["input_output_aliases"] = {0: 0}

    if n_col_blocks == 1:
        # 1-D grid over row tiles.  The keep row's block index is constant, so
        # it is DMA'd once and stays resident in VMEM; every x/out DMA is a
        # single contiguous full-width stream.
        grid = (n_row_blocks,)
        x_spec = pl.BlockSpec((block_r, block_c), lambda i: (i, 0))
        keep_spec = pl.BlockSpec((1, block_c), lambda i: (0, 0))
        out_spec = pl.BlockSpec((block_r, block_c), lambda i: (i, 0))
        semantics = ("parallel",)
    else:
        # Column axis outermost: the keep tile's block index (0, j) only
        # changes on the rare outer steps, so it is not re-DMA'd every inner
        # step.
        grid = (n_col_blocks, n_row_blocks)
        x_spec = pl.BlockSpec((block_r, block_c), lambda j, i: (i, j))
        keep_spec = pl.BlockSpec((1, block_c), lambda j, i: (0, j))
        out_spec = pl.BlockSpec((block_r, block_c), lambda j, i: (i, j))
        semantics = ("parallel", "parallel")

    return pl.pallas_call(
        _mask_kernel,
        out_shape=jax.ShapeDtypeStruct((rows, cols), x2d.dtype),
        grid_spec=pltpu.PrefetchScalarGridSpec(
            num_scalar_prefetch=0,
            grid=grid,
            in_specs=[x_spec, keep_spec],
            out_specs=out_spec,
        ),
        compiler_params=pltpu.CompilerParams(
            dimension_semantics=semantics,
            vmem_limit_bytes=_VMEM_LIMIT_BYTES,
        ),
        cost_estimate=cost,
        **extra,
    )(x2d, keep_row2d)


def node_feature_masking(data, key, p=0.15):
    """Functional equivalent of NodeFeatureMasking.forward.

    data: dict with keys x, y, edge_index, edge_attr, train_mask, test_mask.
    Returns (new_data dict with column-masked x, idx bool mask of shape (d,)).
    """
    x = data["x"]
    n, d = x.shape

    # idx = uniform(0,1) < p  -> masked columns; keep = ~idx as float32 {1,0}.
    u = jax.random.uniform(key, (d,), dtype=jnp.float32)
    idx = u < p
    keep_row = jnp.where(idx, 0.0, 1.0).astype(jnp.float32)
    zero = jnp.zeros((), x.dtype)

    if d % 128 == 0:
        # Already lane-dense: full-width stores with no reshape.
        x_masked = node_feature_masking_kernel(x, keep_row.reshape(1, d))
    else:
        # Group g consecutive rows so the slab's last dim is a multiple of 128
        # (full-width unmasked vector stores).
        g = 128 // math.gcd(d, 128)
        n_head = (n // g) * g
        keep2d = jnp.tile(keep_row, g).reshape(1, g * d)
        if n_head == n:
            x_masked = node_feature_masking_kernel(
                x.reshape(n // g, g * d), keep2d).reshape(n, d)
        elif n_head == 0:
            # Fewer than g (<=128) rows total: narrow-lane kernel path; input
            # is tiny so masked partial stores are irrelevant.
            x_masked = node_feature_masking_kernel(x, keep_row.reshape(1, d))
        else:
            # Head/tail split: lane-dense kernel on the aligned head, plain
            # select on the < g (<=128)-row tail.
            head = node_feature_masking_kernel(
                x[:n_head].reshape(n_head // g, g * d), keep2d
            ).reshape(n_head, d)
            tail = jnp.where(idx[None, :], zero, x[n_head:])
            x_masked = jnp.concatenate([head, tail], axis=0)

    new_data = {
        "x": x_masked,
        "y": data["y"],
        "edge_index": data["edge_index"],
        "edge_attr": data["edge_attr"],
        "train_mask": data["train_mask"],
        "test_mask": data["test_mask"],
    }
    return new_data, idx


if __name__ == "__main__":
    key = jax.random.PRNGKey(0)
    k_x, k_ea, k_mask, k_x2, k_mask2, k_x3, k_mask3 = jax.random.split(key, 7)

    # ---- Test 1: lane-dense reshape path (d=32 -> group 4 rows -> 128 lanes) ----
    n, d, e = 16, 32, 24
    x = jax.random.normal(k_x, (n, d), dtype=jnp.float32)
    y = jnp.arange(n, dtype=jnp.int32) % 4
    edge_index = jnp.stack(
        [jnp.arange(e, dtype=jnp.int32) % n,
         (jnp.arange(e, dtype=jnp.int32) * 3 + 1) % n], axis=0)
    edge_attr = jax.random.normal(k_ea, (e, 4), dtype=jnp.float32)
    train_mask = (jnp.arange(n) % 2 == 0)
    test_mask = ~train_mask

    data = {
        "x": x, "y": y, "edge_index": edge_index, "edge_attr": edge_attr,
        "train_mask": train_mask, "test_mask": test_mask,
    }

    new_data, idx = node_feature_masking(data, k_mask, p=0.15)
    x_out = jax.block_until_ready(new_data["x"])
    x_ref = jnp.where(idx[None, :], 0.0, x)
    assert jnp.allclose(x_out, x_ref), "mismatch vs reference (test 1)"
    assert new_data["edge_index"] is edge_index
    assert new_data["y"] is y

    # NaN-safety: masked columns must become exactly 0 even when non-finite.
    x_nan = jnp.where(idx[None, :], jnp.nan, x)
    out_nan, _ = node_feature_masking(dict(data, x=x_nan), k_mask, p=0.15)
    jax.block_until_ready(out_nan["x"])
    assert jnp.allclose(out_nan["x"], x_ref), "NaN columns not zeroed"

    # ---- Test 2: ragged rows -> head/tail split (d=40, g=16, n=40: head 32 + tail 8) ----
    n2, d2 = 40, 40
    x2 = jax.random.normal(k_x2, (n2, d2), dtype=jnp.float32)
    data2 = {
        "x": x2, "y": jnp.zeros((n2,), jnp.int32),
        "edge_index": jnp.zeros((2, 4), jnp.int32),
        "edge_attr": jnp.zeros((4, 2), jnp.float32),
        "train_mask": jnp.ones((n2,), bool), "test_mask": jnp.zeros((n2,), bool),
    }
    out2, idx2 = node_feature_masking(data2, k_mask2, p=0.5)
    x2_out = jax.block_until_ready(out2["x"])
    assert jnp.allclose(x2_out, jnp.where(idx2[None, :], 0.0, x2)), \
        "mismatch vs reference (test 2)"

    # ---- Test 3: already lane-aligned d (d=256), >=2 row tiles (megacore) ----
    n3, d3 = 64, 256
    x3 = jax.random.normal(k_x3, (n3, d3), dtype=jnp.float32)
    data3 = {
        "x": x3, "y": jnp.zeros((n3,), jnp.int32),
        "edge_index": jnp.zeros((2, 4), jnp.int32),
        "edge_attr": jnp.zeros((4, 2), jnp.float32),
        "train_mask": jnp.ones((n3,), bool), "test_mask": jnp.zeros((n3,), bool),
    }
    out3, idx3 = node_feature_masking(data3, k_mask3, p=0.3)
    x3_out = jax.block_until_ready(out3["x"])
    assert jnp.allclose(x3_out, jnp.where(idx3[None, :], 0.0, x3)), \
        "mismatch vs reference (test 3)"

    print("KERNEL_OK")
</pallas_src>

<mosaic_0001>
module attributes {stable_mosaic.version = 11 : i64} {
  func.func @_mask_kernel(%arg0: i32, %arg1: memref<4x128xf32, #tpu.memory_space<vmem>>, %arg2: memref<1x128xf32, #tpu.memory_space<vmem>>, %arg3: memref<4x128xf32, #tpu.memory_space<vmem>>) attributes {dimension_semantics = [#tpu.dimension_semantics<parallel>], iteration_bounds = array<i64: 1>, scalar_prefetch = 0 : i64, scratch_operands = 0 : i64, tpu.core_type = #tpu.core_type<tc>, window_params = [{transform_indices = @transform_0, window_bounds = array<i64: 4, 128>}, {pipeline_mode = #tpu.pipeline_mode<synchronous>, transform_indices = @transform_1, window_bounds = array<i64: 1, 128>}, {transform_indices = @transform_2, window_bounds = array<i64: 4, 128>}]} {
    %c0 = arith.constant 0 : index
    %c0_0 = arith.constant 0 : index
    %0 = vector.load %arg1[%c0, %c0_0] : memref<4x128xf32, #tpu.memory_space<vmem>>, vector<4x128xf32>
    %c0_1 = arith.constant 0 : index
    %c0_2 = arith.constant 0 : index
    %1 = vector.load %arg2[%c0_1, %c0_2] : memref<1x128xf32, #tpu.memory_space<vmem>>, vector<1x128xf32>
    %cst = arith.constant 0.000000e+00 : f32
    %2 = vector.broadcast %cst : f32 to vector<1x128xf32>
    %3 = arith.cmpf one, %1, %2 : vector<1x128xf32>
    %cst_3 = arith.constant 0.000000e+00 : f32
    %4 = vector.broadcast %cst_3 : f32 to vector<4x128xf32>
    %5 = vector.shape_cast %3 : vector<1x128xi1> to vector<1x128xi1>
    %6 = vector.broadcast %5 : vector<1x128xi1> to vector<4x128xi1>
    %7 = arith.select %6, %0, %4 : vector<4x128xi1>, vector<4x128xf32>
    %c0_4 = arith.constant 0 : index
    %c0_5 = arith.constant 0 : index
    %8 = vector.load %arg3[%c0_4, %c0_5] : memref<4x128xf32, #tpu.memory_space<vmem>>, vector<4x128xf32>
    tpu.vector_store %arg3[%c0_4, %c0_5], %7 {strides = array<i32>} : memref<4x128xf32, #tpu.memory_space<vmem>>, vector<4x128xf32>,
    return
  }
  func.func @transform_0(%arg0: i32) -> (i32, i32) {
    %c0_i32 = arith.constant 0 : i32
    %c0_i32_0 = arith.constant 0 : i32
    return %arg0, %c0_i32 : i32, i32
  }
  func.func @transform_1(%arg0: i32) -> (i32, i32) {
    %c0_i32 = arith.constant 0 : i32
    %c0_i32_0 = arith.constant 0 : i32
    %c0_i32_1 = arith.constant 0 : i32
    return %c0_i32, %c0_i32_0 : i32, i32
  }
  func.func @transform_2(%arg0: i32) -> (i32, i32) {
    %c0_i32 = arith.constant 0 : i32
    %c0_i32_0 = arith.constant 0 : i32
    return %arg0, %c0_i32 : i32, i32
  }
}

</mosaic_0001>

<bundles_post_ra>
// kernel: tpu_custom_call.1
= control target key start
LH: loop header
LB: loop body
LE: loop exit
PB: predicated region body
PF: predicated region fallthrough
CT: control target
= control target key end

     0   :  { %7 = vsyncpa [#allocation3], 0  ;;  %s146_s0 = inlined_call_operand.hbm [shape: f32[4,128], index: 0, kind: input, shape index: {}]   ;;  %s147_s1 = inlined_call_operand.vmem [shape: f32[1,128], index: 1, kind: input, shape index: {}]   ;;  %s148_s2 = inlined_call_operand.hbm [shape: f32[4,128], index: 2, kind: output, shape index: {}]  }
   0x1   :  { %8 = vsyncpa [#allocation4], 0  ;;  %s101_s9 = smov [#allocation2]   ;;  %s53_s13 = scalar_lea.hbm %s146_s0, 64 }
   0x2   :  { %s15_s10 = sshll.u32 %s101_s9, 4  ;;  %p54_p0 = scmp.ne.s32.totalorder %s146_s0, %s53_s13  ;;  %s16_s10 = int_to_ptr.vmem [resolvable:$true] %s15_s10 }
   0x3   :  { %p57_p1 = scmp.lt.u32.totalorder %s53_s13, %s146_s0 }
   0x5   :  { %p59_p2 = pnand %p57_p1, %p54_p0 }
   0x7   :  { %62 = shalt.err (!%p59_p2)
}
   0x8   :  { %s63_s18 = scalar_lea.vmem %s16_s10, 64  ;;  %p68_p4 = scmp.lt.s32.totalorder %s16_s10, %s16_s10 }
   0x9   :  { %p64_p3 = scmp.ne.s32.totalorder %s16_s10, %s63_s18  ;;  %p69_p5 = scmp.lt.s32.totalorder %s63_s18, %s63_s18 }
   0xb   :  { %p70_p6 = por %p69_p5, %p68_p4 }
   0xd   :  { %p71_p7 = pnand %p70_p6, %p64_p3 }
   0xf   :  { %74 = shalt.err (!%p71_p7)
}
  0x10   :  { %18 = dma.hbm_to_vmem [thread:$0]  %s146_s0, 64, %s16_s10, [#allocation3]  }
  0x11   :  { %97 = dma.done.wait [#allocation3], 64  }
  0x12   :  { %98 = vsyncadd [#allocation3], 4294967232  ;;  %v28_v0 = vlaneseq  ;;  %v25_v3 = vld [vmem:[%s147_s1] sm:$0x1]  ;;  %v102_v4 = vmov 0   ;;  %s103_s23 = smov [#allocation5]  }
  0x13   :  { %vm26_vm0 = vcmp.ne.f32.partialorder %v25_v3, 0.0  ;;  %s41_s24 = sshll.u32 %s103_s23, 4  ;;  %v24_v6 = vld [vmem:[#allocation2] sm:$0xf]  ;;  %s42_s24 = int_to_ptr.vmem [resolvable:$true] %s41_s24 }
  0x14   :  { %v29_v1 = vshrl.u32 %v28_v0, 7  ;;  %v27_v5 = vsel %vm26_vm0, 1, %v102_v4  ;;  %s75_s0 = scalar_lea.vmem %s42_s24, 64  ;;  %p80_p9 = scmp.lt.s32.totalorder %s42_s24, %s42_s24 }
  0x15   :  { %p76_p8 = scmp.ne.s32.totalorder %s42_s24, %s75_s0  ;;  %p81_p10 = scmp.lt.s32.totalorder %s75_s0, %s75_s0 }
  0x16   :  { %v30_v2 = vsub.s32 0, %v29_v1 }
  0x17   :  { %p82_p11 = por %p81_p10, %p80_p9 }
  0x18   :  { %v31_v7 = vrot.slane %v27_v5, %v30_v2 }
  0x19   :  { %p83_p12 = pnand %p82_p11, %p76_p8 }
  0x1a   :  { %vm32_vm1 = vcmp.eq.s32.totalorder %v31_v7, 1 }
  0x1b   :  { %v33_v8 = vsel %vm32_vm1, %v24_v6, 0.0 }
  0x1c   :  { %34 = vst [vmem:[#allocation5] sm:$0xf] %v33_v8 }
  0x1d   :  { %86 = shalt.err (!%p83_p12)
}
  0x1e   :  { %s87_s26 = scalar_lea.hbm %s148_s2, 64 }
  0x1f   :  { %p88_p13 = scmp.ne.s32.totalorder %s148_s2, %s87_s26  ;;  %p91_p0 = scmp.lt.u32.totalorder %s87_s26, %s148_s2 }
  0x21   :  { %p93_p1 = pnand %p91_p0, %p88_p13 }
  0x23   :  { %96 = shalt.err (!%p93_p1)
}
  0x24   :  { %44 = dma.vmem_to_hbm [thread:$0]  %s42_s24, 64, %s148_s2, [#allocation4]  }
  0x25   :  { %99 = dma.done.wait [#allocation4], 64  }
  0x26   :  { %100 = vsyncadd [#allocation4], 4294967232 }
  0x27   :  { %48 = vsyncpa [#allocation3], 1 }
  0x28   :  { %49 = vsyncpa [#allocation4], 1 }

</bundles_post_ra>
